<compile_context>
chip_gen: v7x
topology: tpu7x:2x2x1
jax: 0.10.0
libtpu: 0.0.40
codegen_flags: <defaults>
</compile_context>

<pallas_src>
import functools

import jax
import jax.numpy as jnp
from jax.experimental import pallas as pl
from jax.experimental.pallas import tpu as pltpu


def _round_up(n, m):
    return ((n + m - 1) // m) * m


def _mlp_kernel(x_ref, w1_ref, b1_ref, w2_ref, b2_ref, w3_ref, b3_ref, o_ref):
    """Fused 3-layer MLP on one (tm, fold*D) row tile.

    Weights/biases stay VMEM-resident across all grid steps (constant
    index_maps). All matmuls accumulate in f32; bias add / ReLU happen in f32,
    then are cast back to the compute dtype for the next MXU pass.
    """
    cdt = w1_ref.dtype
    x = x_ref[...]                                                       # (tm, fold*D)
    h = jnp.dot(x, w1_ref[...], preferred_element_type=jnp.float32) + b1_ref[...]
    h = jnp.maximum(h, 0.0).astype(cdt)                                  # ReLU 1
    h = jnp.dot(h, w2_ref[...], preferred_element_type=jnp.float32) + b2_ref[...]
    h = jnp.maximum(h, 0.0).astype(cdt)                                  # ReLU 2
    y = jnp.dot(h, w3_ref[...], preferred_element_type=jnp.float32) + b3_ref[...]
    o_ref[...] = y.astype(o_ref.dtype)


def mlp_forward(x, w1, b1, w2, b2, w3, b3, *,
                block_rows=4096, fold=2, min_rows_for_pallas=1024):
    """x: (..., input_dim). Weights in PyTorch Linear layout: w_k (out, in),
    b_k (out,). Returns (..., output_dim) in x.dtype.

    block_rows: max super-rows per grid step (4096 super-rows * 128 f32 = 2 MiB).
    fold:       rows packed per super-row (2 -> 128-lane-dense I/O on all gens).
    min_rows_for_pallas: below this many rows, fall back to plain XLA (dispatch
                         + one grid step is pure overhead for tiny batches).
    """
    *lead, D = x.shape
    H1, H2, O = w1.shape[0], w2.shape[0], w3.shape[0]
    cdt = x.dtype

    x2 = x.reshape(-1, D)
    M = x2.shape[0]

    if M < min_rows_for_pallas:
        # Too small to amortize a pallas_call; let XLA fuse the dot+ReLU chain.
        h = jnp.maximum(
            jnp.dot(x2, jnp.transpose(w1).astype(cdt),
                    preferred_element_type=jnp.float32) + b1.astype(jnp.float32), 0.0
        ).astype(cdt)
        h = jnp.maximum(
            jnp.dot(h, jnp.transpose(w2).astype(cdt),
                    preferred_element_type=jnp.float32) + b2.astype(jnp.float32), 0.0
        ).astype(cdt)
        y = (jnp.dot(h, jnp.transpose(w3).astype(cdt),
                     preferred_element_type=jnp.float32) + b3.astype(jnp.float32))
        return y.astype(cdt).reshape(*lead, O)

    # ---- 2-way row folding: lane-dense (fold*64 = 128 wide) HBM tiles. ----
    fold = max(1, int(fold))
    M_pad = _round_up(M, fold)
    if M_pad != M:
        x2 = jnp.pad(x2, ((0, M_pad - M), (0, 0)))
    Mf = M_pad // fold

    xf = x2.reshape(Mf, fold * D).astype(cdt)            # (Mf, fold*D)
    eye = jnp.eye(fold, dtype=cdt)
    # Block-diagonal (per-"super-row"-slot) weights: bit-exact, off-diagonal
    # zeros contribute exact zeros to the f32 accumulator.
    w1f = jnp.kron(eye, jnp.transpose(w1).astype(cdt))   # (fold*D,  fold*H1)
    w2f = jnp.kron(eye, jnp.transpose(w2).astype(cdt))   # (fold*H1, fold*H2)
    w3f = jnp.kron(eye, jnp.transpose(w3).astype(cdt))   # (fold*H2, fold*O)
    b1f = jnp.tile(b1.astype(jnp.float32), fold).reshape(1, fold * H1)
    b2f = jnp.tile(b2.astype(jnp.float32), fold).reshape(1, fold * H2)
    b3f = jnp.tile(b3.astype(jnp.float32), fold).reshape(1, fold * O)

    # ---- Row-tile choice: big tiles to amortize per-step overhead, but keep
    # >= 2 grid steps for large problems so both v7x TensorCores get work. ----
    if Mf <= 1024:
        tm = Mf                                           # single step; full dim OK
    else:
        tm = min(block_rows, _round_up(pl.cdiv(Mf, 2), 8))
    grid = (pl.cdiv(Mf, tm),)

    out = pl.pallas_call(
        _mlp_kernel,
        out_shape=jax.ShapeDtypeStruct((Mf, fold * O), cdt),
        grid_spec=pltpu.PrefetchScalarGridSpec(
            num_scalar_prefetch=0,
            grid=grid,
            in_specs=[
                pl.BlockSpec((tm, fold * D), lambda i: (i, 0)),       # activation tile
                pl.BlockSpec((fold * D, fold * H1), lambda i: (0, 0)),   # W1' (resident)
                pl.BlockSpec((1, fold * H1), lambda i: (0, 0)),          # b1'
                pl.BlockSpec((fold * H1, fold * H2), lambda i: (0, 0)),  # W2' (resident)
                pl.BlockSpec((1, fold * H2), lambda i: (0, 0)),          # b2'
                pl.BlockSpec((fold * H2, fold * O), lambda i: (0, 0)),   # W3' (resident)
                pl.BlockSpec((1, fold * O), lambda i: (0, 0)),           # b3'
            ],
            out_specs=pl.BlockSpec((tm, fold * O), lambda i: (i, 0)),
        ),
        compiler_params=pltpu.CompilerParams(
            dimension_semantics=("parallel",),            # rows independent -> megacore
        ),
    )(xf, w1f, b1f, w2f, b2f, w3f, b3f)

    out = out.reshape(M_pad, O)[:M]
    return out.reshape(*lead, O)


def mlp_reference(x, w1, b1, w2, b2, w3, b3):
    """Pure-JAX reference identical to the PyTorch MLP forward."""
    h = jnp.maximum(x @ w1.T + b1, 0.0)
    h = jnp.maximum(h @ w2.T + b2, 0.0)
    return h @ w3.T + b3


if __name__ == "__main__":
    input_dim = 64
    output_dim = 64

    key = jax.random.PRNGKey(0)
    kx1, kx2, k1, k2, k3 = jax.random.split(key, 5)

    # PyTorch init_weights(): kaiming_normal_(fan_in, relu) -> std=sqrt(2/fan_in),
    # biases zero.
    def kaiming(k, out_d, in_d):
        return jax.random.normal(k, (out_d, in_d), jnp.float32) * jnp.sqrt(2.0 / in_d)

    w1 = kaiming(k1, 32, input_dim)
    b1 = jnp.zeros((32,), jnp.float32)
    w2 = kaiming(k2, 32, 32)
    b2 = jnp.zeros((32,), jnp.float32)
    w3 = kaiming(k3, output_dim, 32)
    b3 = jnp.zeros((output_dim,), jnp.float32)

    # --- Test 1: small shape (batch=2, seq=8); force the Pallas path so the
    # kernel itself is exercised and verified. ---
    x_small = jax.random.normal(kx1, (2, 8, input_dim), jnp.float32)
    fwd_forced = jax.jit(functools.partial(mlp_forward, min_rows_for_pallas=0))
    out_small = jax.block_until_ready(fwd_forced(x_small, w1, b1, w2, b2, w3, b3))
    ref_small = mlp_reference(x_small, w1, b1, w2, b2, w3, b3)
    assert out_small.shape == (2, 8, output_dim)
    assert jnp.allclose(out_small, ref_small, atol=5e-4, rtol=5e-4), (
        f"small: max abs err = {jnp.max(jnp.abs(out_small - ref_small))}"
    )

    # --- Test 2: larger, odd row count (exercises fold padding, partial last
    # tile, and the >=2-step "parallel" grid used for megacore). ---
    x_big = jax.random.normal(kx2, (2051, input_dim), jnp.float32)
    fwd = jax.jit(mlp_forward)
    out_big = jax.block_until_ready(fwd(x_big, w1, b1, w2, b2, w3, b3))
    ref_big = mlp_reference(x_big, w1, b1, w2, b2, w3, b3)
    assert out_big.shape == (2051, output_dim)
    assert jnp.allclose(out_big, ref_big, atol=5e-4, rtol=5e-4), (
        f"big: max abs err = {jnp.max(jnp.abs(out_big - ref_big))}"
    )

    print("KERNEL_OK")
</pallas_src>

<mosaic_0001>
module attributes {stable_mosaic.version = 11 : i64} {
  func.func @_mlp_kernel(%arg0: i32, %arg1: memref<8x128xf32, #tpu.memory_space<vmem>>, %arg2: memref<128x64xf32, #tpu.memory_space<vmem>>, %arg3: memref<1x64xf32, #tpu.memory_space<vmem>>, %arg4: memref<64x64xf32, #tpu.memory_space<vmem>>, %arg5: memref<1x64xf32, #tpu.memory_space<vmem>>, %arg6: memref<64x128xf32, #tpu.memory_space<vmem>>, %arg7: memref<1x128xf32, #tpu.memory_space<vmem>>, %arg8: memref<8x128xf32, #tpu.memory_space<vmem>>) attributes {dimension_semantics = [#tpu.dimension_semantics<parallel>], iteration_bounds = array<i64: 1>, scalar_prefetch = 0 : i64, scratch_operands = 0 : i64, tpu.core_type = #tpu.core_type<tc>, window_params = [{transform_indices = @transform_0, window_bounds = array<i64: 8, 128>}, {pipeline_mode = #tpu.pipeline_mode<synchronous>, transform_indices = @transform_1, window_bounds = array<i64: 128, 64>}, {pipeline_mode = #tpu.pipeline_mode<synchronous>, transform_indices = @transform_2, window_bounds = array<i64: 1, 64>}, {pipeline_mode = #tpu.pipeline_mode<synchronous>, transform_indices = @transform_3, window_bounds = array<i64: 64, 64>}, {pipeline_mode = #tpu.pipeline_mode<synchronous>, transform_indices = @transform_4, window_bounds = array<i64: 1, 64>}, {pipeline_mode = #tpu.pipeline_mode<synchronous>, transform_indices = @transform_5, window_bounds = array<i64: 64, 128>}, {pipeline_mode = #tpu.pipeline_mode<synchronous>, transform_indices = @transform_6, window_bounds = array<i64: 1, 128>}, {transform_indices = @transform_7, window_bounds = array<i64: 8, 128>}]} {
    %c0 = arith.constant 0 : index
    %c0_0 = arith.constant 0 : index
    %0 = vector.load %arg1[%c0, %c0_0] : memref<8x128xf32, #tpu.memory_space<vmem>>, vector<8x128xf32>
    %c0_1 = arith.constant 0 : index
    %c0_2 = arith.constant 0 : index
    %1 = vector.load %arg2[%c0_1, %c0_2] : memref<128x64xf32, #tpu.memory_space<vmem>>, vector<128x64xf32>
    %cst = arith.constant dense<0.000000e+00> : vector<8x64xf32>
    %2 = tpu.matmul %0, %1, %cst {dimension_numbers = #tpu.dot_dimension_numbers<[1], [0], [0], [1], [0, 0, 1, 1], [], []>} : vector<8x128xf32>, vector<128x64xf32>, vector<8x64xf32> -> vector<8x64xf32>
    %c0_3 = arith.constant 0 : index
    %c0_4 = arith.constant 0 : index
    %3 = vector.load %arg3[%c0_3, %c0_4] : memref<1x64xf32, #tpu.memory_space<vmem>>, vector<1x64xf32>
    %4 = vector.broadcast %3 : vector<1x64xf32> to vector<8x64xf32>
    %5 = arith.addf %2, %4 : vector<8x64xf32>
    %cst_5 = arith.constant 0.000000e+00 : f32
    %6 = vector.broadcast %cst_5 : f32 to vector<8x64xf32>
    %7 = arith.maximumf %5, %6 : vector<8x64xf32>
    %c0_6 = arith.constant 0 : index
    %c0_7 = arith.constant 0 : index
    %8 = vector.load %arg4[%c0_6, %c0_7] : memref<64x64xf32, #tpu.memory_space<vmem>>, vector<64x64xf32>
    %cst_8 = arith.constant dense<0.000000e+00> : vector<8x64xf32>
    %9 = tpu.matmul %7, %8, %cst_8 {dimension_numbers = #tpu.dot_dimension_numbers<[1], [0], [0], [1], [0, 0, 1, 1], [], []>} : vector<8x64xf32>, vector<64x64xf32>, vector<8x64xf32> -> vector<8x64xf32>
    %c0_9 = arith.constant 0 : index
    %c0_10 = arith.constant 0 : index
    %10 = vector.load %arg5[%c0_9, %c0_10] : memref<1x64xf32, #tpu.memory_space<vmem>>, vector<1x64xf32>
    %11 = vector.broadcast %10 : vector<1x64xf32> to vector<8x64xf32>
    %12 = arith.addf %9, %11 : vector<8x64xf32>
    %cst_11 = arith.constant 0.000000e+00 : f32
    %13 = vector.broadcast %cst_11 : f32 to vector<8x64xf32>
    %14 = arith.maximumf %12, %13 : vector<8x64xf32>
    %c0_12 = arith.constant 0 : index
    %c0_13 = arith.constant 0 : index
    %15 = vector.load %arg6[%c0_12, %c0_13] : memref<64x128xf32, #tpu.memory_space<vmem>>, vector<64x128xf32>
    %cst_14 = arith.constant dense<0.000000e+00> : vector<8x128xf32>
    %16 = tpu.matmul %14, %15, %cst_14 {dimension_numbers = #tpu.dot_dimension_numbers<[1], [0], [0], [1], [0, 0, 1, 1], [], []>} : vector<8x64xf32>, vector<64x128xf32>, vector<8x128xf32> -> vector<8x128xf32>
    %c0_15 = arith.constant 0 : index
    %c0_16 = arith.constant 0 : index
    %17 = vector.load %arg7[%c0_15, %c0_16] : memref<1x128xf32, #tpu.memory_space<vmem>>, vector<1x128xf32>
    %18 = vector.broadcast %17 : vector<1x128xf32> to vector<8x128xf32>
    %19 = arith.addf %16, %18 : vector<8x128xf32>
    %c0_17 = arith.constant 0 : index
    %c0_18 = arith.constant 0 : index
    %20 = vector.load %arg8[%c0_17, %c0_18] : memref<8x128xf32, #tpu.memory_space<vmem>>, vector<8x128xf32>
    tpu.vector_store %arg8[%c0_17, %c0_18], %19 {strides = array<i32>} : memref<8x128xf32, #tpu.memory_space<vmem>>, vector<8x128xf32>,
    return
  }
  func.func @transform_0(%arg0: i32) -> (i32, i32) {
    %c0_i32 = arith.constant 0 : i32
    %c0_i32_0 = arith.constant 0 : i32
    return %arg0, %c0_i32 : i32, i32
  }
  func.func @transform_1(%arg0: i32) -> (i32, i32) {
    %c0_i32 = arith.constant 0 : i32
    %c0_i32_0 = arith.constant 0 : i32
    %c0_i32_1 = arith.constant 0 : i32
    return %c0_i32, %c0_i32_0 : i32, i32
  }
  func.func @transform_2(%arg0: i32) -> (i32, i32) {
    %c0_i32 = arith.constant 0 : i32
    %c0_i32_0 = arith.constant 0 : i32
    %c0_i32_1 = arith.constant 0 : i32
    return %c0_i32, %c0_i32_0 : i32, i32
  }
  func.func @transform_3(%arg0: i32) -> (i32, i32) {
    %c0_i32 = arith.constant 0 : i32
    %c0_i32_0 = arith.constant 0 : i32
    %c0_i32_1 = arith.constant 0 : i32
    return %c0_i32, %c0_i32_0 : i32, i32
  }
  func.func @transform_4(%arg0: i32) -> (i32, i32) {
    %c0_i32 = arith.constant 0 : i32
    %c0_i32_0 = arith.constant 0 : i32
    %c0_i32_1 = arith.constant 0 : i32
    return %c0_i32, %c0_i32_0 : i32, i32
  }
  func.func @transform_5(%arg0: i32) -> (i32, i32) {
    %c0_i32 = arith.constant 0 : i32
    %c0_i32_0 = arith.constant 0 : i32
    %c0_i32_1 = arith.constant 0 : i32
    return %c0_i32, %c0_i32_0 : i32, i32
  }
  func.func @transform_6(%arg0: i32) -> (i32, i32) {
    %c0_i32 = arith.constant 0 : i32
    %c0_i32_0 = arith.constant 0 : i32
    %c0_i32_1 = arith.constant 0 : i32
    return %c0_i32, %c0_i32_0 : i32, i32
  }
  func.func @transform_7(%arg0: i32) -> (i32, i32) {
    %c0_i32 = arith.constant 0 : i32
    %c0_i32_0 = arith.constant 0 : i32
    return %arg0, %c0_i32 : i32, i32
  }
}

</mosaic_0001>

<bundles_post_ra>
// kernel: tile.18
= control target key start
LH: loop header
LB: loop body
LE: loop exit
PB: predicated region body
PF: predicated region fallthrough
CT: control target
= control target key end

     0   :  { %s22_s0 = inlined_call_operand.vmem [shape: f32[32], index: 0, kind: input, shape index: {}]   ;;  %s23_s1 = inlined_call_operand.vmem [shape: f32[2,32], index: 1, kind: output, shape index: {}]  }
   0x1   :  { %v4_v0 = vld [vmem:[%s22_s0] ss:$0 sm:$0xff] }
   0x2   :  { %5 = vst [vmem:[%s23_s1] sm:$0x3] %v4_v0 }

// kernel: tile.19
= control target key start
LH: loop header
LB: loop body
LE: loop exit
PB: predicated region body
PF: predicated region fallthrough
CT: control target
= control target key end

     0   :  { %vm7_vm0 = vcmask 261120   ;;  %vm13_vm1 = vcmask 523520   ;;  %s39_s0 = inlined_call_operand.vmem [shape: f32[2,32], index: 0, kind: input, shape index: {}]   ;;  %s40_s1 = inlined_call_operand.vmem [shape: f32[1,64], index: 1, kind: output, shape index: {}]  }
   0x1   :  { %v4_v0 = vld [vmem:[%s39_s0] sm:$0x3]  ;;  %s22_s0 = smov 32  }
   0x2   :  { %5 = vst [vmem:[#allocation1] sm:$0x3] %v4_v0 }
   0x9   :  { %v10_v1 = vld [vmem:[#allocation1 + $0x1] sm:$0x1]   ;;  %v6_v2 = vld [vmem:[#allocation1] sm:$0x1]  }
   0xa   :  { %11 = vrot.lane.b32.xlu0 %v10_v1, %s22_s0  ;;  %8 = vst.msk [vmem:[#allocation0] sm:$0x1] %vm7_vm0, %v6_v2  }
  0x7c   :  { %v12_v3 = vpop.permute.xlu0 %11  }
  0x7d   :  { %14 = vst.msk [vmem:[#allocation0] sm:$0x1] %vm13_vm1, %v12_v3  }
  0x84   :  { %v18_v4 = vld [vmem:[#allocation0] sm:$0x1] }
  0x85   :  { %20 = vst [vmem:[%s40_s1] sm:$0x1] %v18_v4 }

// kernel: tile.28
= control target key start
LH: loop header
LB: loop body
LE: loop exit
PB: predicated region body
PF: predicated region fallthrough
CT: control target
= control target key end

     0   :  { %s22_s0 = inlined_call_operand.vmem [shape: f32[64], index: 0, kind: input, shape index: {}]   ;;  %s23_s1 = inlined_call_operand.vmem [shape: f32[2,64], index: 1, kind: output, shape index: {}]  }
   0x1   :  { %v4_v0 = vld [vmem:[%s22_s0] ss:$0 sm:$0xff] }
   0x2   :  { %5 = vst [vmem:[%s23_s1] sm:$0x3] %v4_v0 }

// kernel: tile.29
= control target key start
LH: loop header
LB: loop body
LE: loop exit
PB: predicated region body
PF: predicated region fallthrough
CT: control target
= control target key end

     0   :  { %vm7_vm0 = vcmask 523264   ;;  %vm13_vm1 = vcmask 1048064   ;;  %s39_s0 = inlined_call_operand.vmem [shape: f32[2,64], index: 0, kind: input, shape index: {}]   ;;  %s40_s1 = inlined_call_operand.vmem [shape: f32[1,128], index: 1, kind: output, shape index: {}]  }
   0x1   :  { %v4_v0 = vld [vmem:[%s39_s0] sm:$0x3]  ;;  %s22_s0 = smov 64  }
   0x2   :  { %5 = vst [vmem:[#allocation1] sm:$0x3] %v4_v0 }
   0x9   :  { %v10_v1 = vld [vmem:[#allocation1 + $0x1] sm:$0x1]   ;;  %v6_v2 = vld [vmem:[#allocation1] sm:$0x1]  }
   0xa   :  { %11 = vrot.lane.b32.xlu0 %v10_v1, %s22_s0  ;;  %8 = vst.msk [vmem:[#allocation0] sm:$0x1] %vm7_vm0, %v6_v2  }
  0x7c   :  { %v12_v3 = vpop.permute.xlu0 %11  }
  0x7d   :  { %14 = vst.msk [vmem:[#allocation0] sm:$0x1] %vm13_vm1, %v12_v3  }
  0x84   :  { %v18_v4 = vld [vmem:[#allocation0] sm:$0x1] }
  0x85   :  { %20 = vst [vmem:[%s40_s1] sm:$0x1] %v18_v4 }

// kernel: mlp_forward.1
= control target key start
LH: loop header
LB: loop body
LE: loop exit
PB: predicated region body
PF: predicated region fallthrough
CT: control target
= control target key end

     0   :  { %v468_v0 = vmov 0.0|0.0   ;;  %vm469_vm0 = vmmov 0   ;;  %v470_v4 = vmov 0.0   ;;  %vm136_vm1 = vcmask 523264   ;;  %s646_s1 = inlined_call_operand.vmem [shape: f32[128,64], index: 1, kind: input, shape index: {}]   ;;  %s647_s3 = inlined_call_operand.vmem [shape: f32[64,64], index: 3, kind: input, shape index: {}]   ;;  %s648_s0 = inlined_call_operand.vmem [shape: f32[8,128], index: 0, kind: input, shape index: {}]   ;;  %s649_s2 = inlined_call_operand.vmem [shape: f32[1,64], index: 2, kind: input, shape index: {}]   ;;  %s650_s5 = inlined_call_operand.vmem [shape: f32[64,128], index: 5, kind: input, shape index: {}]   ;;  %s651_s4 = inlined_call_operand.vmem [shape: f32[1,64], index: 4, kind: input, shape index: {}]   ;;  %s652_s6 = inlined_call_operand.vmem [shape: f32[1,128], index: 6, kind: input, shape index: {}]   ;;  %s653_s7 = inlined_call_operand.vmem [shape: f32[8,128], index: 7, kind: output, shape index: {}]  }
   0x1   :  { %417 = vmatprep.subr.bf16.mxu0 %v468_v0  ;;  %v27_v1 = vld [vmem:[%s646_s1] sm:$0xff]  ;;  %v28_v2 = vld [vmem:[%s646_s1 + $0x8] sm:$0xff]  ;;  %v29_v3 = vld [vmem:[%s646_s1 + $0x10] sm:$0xff]  ;;  %376 = vmatprep.mubr.msk.f32.mxu0 %vm469_vm0, %v470_v4 }
   0x2   :  { %v418_v5 = vpack.c.bf16 %v28_v2, %v27_v1  ;;  %v30_v6 = vld [vmem:[%s646_s1 + $0x18] sm:$0xff]  ;;  %441 = vmatprep.subr.bf16.mxu1 %v468_v0  ;;  %395 = vmatprep.mubr.msk.f32.mxu1 %vm469_vm0, %v470_v4  ;;  %v31_v8 = vld [vmem:[%s646_s1 + $0x20] sm:$0xff]  ;;  %v32_v9 = vld [vmem:[%s646_s1 + $0x28] sm:$0xff] }
   0x3   :  { %v421_v7 = vpack.c.bf16 %v30_v6, %v29_v3  ;;  %v121_v10 = vld [vmem:[%s647_s3] sm:$0xff]  ;;  %v122_v11 = vld [vmem:[%s647_s3 + $0x8] sm:$0xff]  ;;  %v123_v12 = vld [vmem:[%s647_s3 + $0x10] sm:$0xff]  ;;  %v424_v14 = vpack.c.bf16 %v32_v9, %v31_v8 }
   0x4   :  { %419 = vmatpush3.bf16.msra.mxu0 %v418_v5  ;;  %v124_v13 = vld [vmem:[%s647_s3 + $0x18] sm:$0xff]  ;;  %v442_v15 = vpack.c.bf16 %v122_v11, %v121_v10  ;;  %v33_v16 = vld [vmem:[%s646_s1 + $0x30] sm:$0xff]  ;;  %v125_v19 = vld [vmem:[%s647_s3 + $0x20] sm:$0xff] }
   0x5   :  { %420 = vmatprep.subr.bf16.mxu0 %v468_v0  ;;  %v34_v17 = vld [vmem:[%s646_s1 + $0x38] sm:$0xff]  ;;  %v445_v18 = vpack.c.bf16 %v124_v13, %v123_v12  ;;  %v126_v20 = vld [vmem:[%s647_s3 + $0x28] sm:$0xff]  ;;  %v35_v22 = vld [vmem:[%s646_s1 + $0x40] sm:$0xff] }
   0x6   :  { %443 = vmatpush3.bf16.msra.mxu1 %v442_v15  ;;  %v427_v21 = vpack.c.bf16 %v34_v17, %v33_v16  ;;  %v36_v23 = vld [vmem:[%s646_s1 + $0x48] sm:$0xff]  ;;  %v448_v24 = vpack.c.bf16 %v126_v20, %v125_v19  ;;  %v37_v26 = vld [vmem:[%s646_s1 + $0x50] sm:$0xff]  ;;  %v38_v27 = vld [vmem:[%s646_s1 + $0x58] sm:$0xff] }
   0x7   :  { %444 = vmatprep.subr.bf16.mxu1 %v468_v0  ;;  %v430_v25 = vpack.c.bf16 %v36_v23, %v35_v22  ;;  %v433_v28 = vpack.c.bf16 %v38_v27, %v37_v26  ;;  %v39_v29 = vld [vmem:[%s646_s1 + $0x60] sm:$0xff]  ;;  %v40_v30 = vld [vmem:[%s646_s1 + $0x68] sm:$0xff]  ;;  %v41_v32 = vld [vmem:[%s646_s1 + $0x70] sm:$0xff] }
   0x8   :  { %422 = vmatpush3.bf16.msra.mxu0 %v421_v7  ;;  %v436_v31 = vpack.c.bf16 %v40_v30, %v39_v29  ;;  %v42_v33 = vld [vmem:[%s646_s1 + $0x78] sm:$0xff]  ;;  %v26_v35 = vld [vmem:[%s648_s0] sm:$0xff]  ;;  %v127_v36 = vld [vmem:[%s647_s3 + $0x30] sm:$0xff] }
   0x9   :  { %423 = vmatprep.subr.bf16.mxu0 %v468_v0  ;;  %v439_v34 = vpack.c.bf16 %v42_v33, %v41_v32  ;;  %v128_v37 = vld [vmem:[%s647_s3 + $0x38] sm:$0xff]  ;;  %v304_v39 = vld [vmem:[%s649_s2] ss:$0 sm:$0xff]  ;;  %v212_v41 = vld [vmem:[%s650_s5 + $0x8] sm:$0xff] }
   0xa   :  { %446 = vmatpush3.bf16.msra.mxu1 %v445_v18  ;;  %v451_v38 = vpack.c.bf16 %v128_v37, %v127_v36  ;;  %v211_v40 = vld [vmem:[%s650_s5] sm:$0xff]  ;;  %v213_v47 = vld [vmem:[%s650_s5 + $0x10] sm:$0xff]  ;;  %v214_v48 = vld [vmem:[%s650_s5 + $0x18] sm:$0xff] }
   0xb   :  { %447 = vmatprep.subr.bf16.mxu1 %v468_v0  ;;  %v454_v45 = vpack.c.bf16 %v212_v41, %v211_v40  ;;  %v457_v49 = vpack.c.bf16 %v214_v48, %v213_v47  ;;  %v215_v50 = vld [vmem:[%s650_s5 + $0x20] sm:$0xff]  ;;  %v216_v51 = vld [vmem:[%s650_s5 + $0x28] sm:$0xff]  ;;  %v217_v53 = vld [vmem:[%s650_s5 + $0x30] sm:$0xff] }
   0xc   :  { %425 = vmatpush3.bf16.msra.mxu0 %v424_v14  ;;  %v460_v52 = vpack.c.bf16 %v216_v51, %v215_v50  ;;  %v218_v54 = vld [vmem:[%s650_s5 + $0x38] sm:$0xff]  ;;  %v305_v56 = vld [vmem:[%s651_s4] ss:$0 sm:$0xff] }
   0xd   :  { %426 = vmatprep.subr.bf16.mxu0 %v468_v0  ;;  %v463_v55 = vpack.c.bf16 %v218_v54, %v217_v53  ;;  %v307_v61 = vld [vmem:[%s652_s6] ss:$0 sm:$0xff] }
   0xe   :  { %449 = vmatpush3.bf16.msra.mxu1 %v448_v24 }
   0xf   :  { %450 = vmatprep.subr.bf16.mxu1 %v468_v0 }
  0x10   :  { %428 = vmatpush3.bf16.msra.mxu0 %v427_v21 }
  0x11   :  { %429 = vmatprep.subr.bf16.mxu0 %v468_v0 }
  0x12   :  { %452 = vmatpush3.bf16.msra.mxu1 %v451_v38 }
  0x13   :  { %453 = vmatprep.subr.bf16.mxu1 %v468_v0 }
  0x14   :  { %431 = vmatpush3.bf16.msra.mxu0 %v430_v25 }
  0x15   :  { %432 = vmatprep.subr.bf16.mxu0 %v468_v0 }
  0x18   :  { %434 = vmatpush3.bf16.msra.mxu0 %v433_v28 }
  0x19   :  { %435 = vmatprep.subr.bf16.mxu0 %v468_v0 }
  0x1c   :  { %437 = vmatpush3.bf16.msra.mxu0 %v436_v31 }
  0x1d   :  { %438 = vmatprep.subr.bf16.mxu0 %v468_v0 }
  0x20   :  { %440 = vmatpush3.bf16.msra.mxu0 %v439_v34 }
  0x23   :  { %377 = vmatmul.mubr.f32.vlgmr.msra.gmra.mrb[0].mxu0 %v26_v35 }
  0xf6   :  { %v116_v42 = vpop.f32.mrb[0].mxu0 }
  0xf7   :  { %v117_v43 = vadd.f32 %v304_v39, %v116_v42  ;;  %v378_v44 = vpop.f32.mrb[1].mxu0 }
  0xf9   :  { %v120_v46 = vmax.f32 %v117_v43, 0.0 }
  0xfb   :  { %396 = vmatmul.mubr.msk.f32.vlgmr.msra.gmra.mrb[0].mxu1 %vm136_vm1, %v120_v46 }
  0xfc   :  { %455 = vmatpush3.bf16.msra.mxu1 %v454_v45  ;;  %414 = vmatprep.mubr.msk.f32.mxu1 %vm469_vm0, %v470_v4 }
  0xfd   :  { %456 = vmatprep.subr.bf16.mxu1 %v468_v0 }
 0x100   :  { %458 = vmatpush3.bf16.msra.mxu1 %v457_v49 }
 0x101   :  { %459 = vmatprep.subr.bf16.mxu1 %v468_v0 }
 0x104   :  { %461 = vmatpush3.bf16.msra.mxu1 %v460_v52 }
 0x105   :  { %462 = vmatprep.subr.bf16.mxu1 %v468_v0 }
 0x108   :  { %464 = vmatpush3.bf16.msra.mxu1 %v463_v55 }
 0x1ce   :  { %v206_v57 = vpop.f32.mrb[0].mxu1 }
 0x1cf   :  { %v207_v58 = vadd.f32 %v305_v56, %v206_v57  ;;  %v397_v59 = vpop.f32.mrb[1].mxu1 }
 0x1d1   :  { %v210_v60 = vmax.f32 %v207_v58, 0.0 }
 0x1d3   :  { %415 = vmatmul.mubr.msk.f32.vlgmr.msra.gmra.mrb[2].mxu1 %vm136_vm1, %v210_v60 }
 0x2a6   :  { %v295_v62 = vpop.f32.mrb[2].mxu1 }
 0x2a7   :  { %v296_v63 = vadd.f32 %v307_v61, %v295_v62  ;;  %v416_v0 = vpop.f32.mrb[3].mxu1 }
 0x2a9   :  { %299 = vst [vmem:[%s653_s7] sm:$0xff] %v296_v63 }

</bundles_post_ra>
